<compile_context>
chip_gen: v7x
topology: tpu7x:2x2x1
jax: 0.10.0
libtpu: 0.0.40
codegen_flags: <defaults>
</compile_context>

<pallas_src>
import functools

import jax
import jax.numpy as jnp
from jax.experimental import pallas as pl
from jax.experimental.pallas import tpu as pltpu


_MIB = 1024 * 1024
# Per-kernel VMEM budget used to choose between the single-pass path and the
# chunked two-sweep path (sized to stay well inside v7x's 64 MiB physical VMEM).
_MONO_VMEM_BUDGET = 48 * _MIB
# Target VMEM footprint per chunk for the chunked path.
_CHUNK_VMEM_TARGET = 16 * _MIB


def _attention_scale(xp, wstk, bstk, wr, br, c_m, c_n):
    """Double-attention math on the pooled features.

    xp: (C, T) pooled features (f32).  Returns the (C, T) per-frame scale."""
    # Fused A/B/V projections: one (c_m + 2*c_n, C) x (C, T) matmul + bias.
    proj = jnp.dot(wstk, xp, preferred_element_type=jnp.float32) + bstk
    feat_a = proj[:c_m]                       # (c_m, T)
    feat_b = proj[c_m:c_m + c_n]              # (c_n, T)
    feat_v = proj[c_m + c_n:]                 # (c_n, T)

    # attention_maps = softmax over T (last axis).
    feat_b = feat_b - jnp.max(feat_b, axis=-1, keepdims=True)
    e_b = jnp.exp(feat_b)
    # reciprocal-multiply (EUP) instead of a vector divide; approx=False keeps
    # full f32 accuracy (the softmaxes are tiny, accuracy is free here).
    att_maps = e_b * pl.reciprocal(jnp.sum(e_b, axis=-1, keepdims=True), approx=False)

    # attention_vectors = softmax over the channel axis (torch dim=1).
    feat_v = feat_v - jnp.max(feat_v, axis=0, keepdims=True)
    e_v = jnp.exp(feat_v)
    att_vec = e_v * pl.reciprocal(jnp.sum(e_v, axis=0, keepdims=True), approx=False)

    # global_descriptors = A @ att_maps^T  (contract over T).
    gd = jax.lax.dot_general(feat_a, att_maps, (((1,), (1,)), ((), ())),
                             preferred_element_type=jnp.float32)           # (c_m, c_n)
    z = jnp.dot(gd, att_vec, preferred_element_type=jnp.float32)           # (c_m, T)

    # conv_reconstruct: 1x1 Conv1d (c_m -> C).
    return jnp.dot(wr, z, preferred_element_type=jnp.float32) + br         # (C, T)


def _da_kernel_full(c_m, c_n, x_ref, pool_ref, exp_ref, wstk_ref, bstk_ref,
                    wr_ref, br_ref, o_ref):
    """Single-pass kernel: one grid step per batch element; slab resident in VMEM."""
    xb = x_ref[0].astype(jnp.float32)                                      # (C, L)
    # AdaptiveAvgPool3d((T,1,1)) as an MXU matmul (keeps the (C, L) tile lane-dense).
    xp = jnp.dot(xb, pool_ref[...], preferred_element_type=jnp.float32)    # (C, T)
    scale = _attention_scale(xp, wstk_ref[...], bstk_ref[...],
                             wr_ref[...], br_ref[...], c_m, c_n)           # (C, T)
    # Broadcast scale over the spatial sites of each frame via a (T, L) 0/1 matmul
    # -- no lane<->sublane relayout of the big tile.
    scale_full = jnp.dot(scale, exp_ref[...], preferred_element_type=jnp.float32)
    o_ref[0] = (xb * scale_full).astype(o_ref.dtype)


def _da_kernel_chunked(c_m, c_n, x_ref, pool_ref, exp_ref, wstk_ref, bstk_ref,
                       wr_ref, br_ref, o_ref, xp_acc, scale_sc):
    """Two-sweep kernel: grid=(B, 2, n_chunks).

    phase 0: accumulate pooled features over lane chunks into xp_acc (C, T).
    phase 1: compute the attention scale once (chunk 0), then stream the
             scale-apply + store for each lane chunk."""
    phase = pl.program_id(1)
    j = pl.program_id(2)
    xb = x_ref[0].astype(jnp.float32)                                      # (C, Lc)

    @pl.when(phase == 0)
    def _pool_sweep():
        part = jnp.dot(xb, pool_ref[...], preferred_element_type=jnp.float32)  # (C, T)

        @pl.when(j == 0)
        def _init():
            xp_acc[...] = part

        @pl.when(j != 0)
        def _acc():
            xp_acc[...] = xp_acc[...] + part

    @pl.when(phase == 1)
    def _apply_sweep():
        @pl.when(j == 0)
        def _attn():
            scale_sc[...] = _attention_scale(xp_acc[...], wstk_ref[...], bstk_ref[...],
                                             wr_ref[...], br_ref[...], c_m, c_n)

        scale_full = jnp.dot(scale_sc[...], exp_ref[...],
                             preferred_element_type=jnp.float32)           # (C, Lc)
        o_ref[0] = (xb * scale_full).astype(o_ref.dtype)


@functools.partial(jax.jit, static_argnames=("chunk_cols", "alias_input"))
def double_attention(x5, params, chunk_cols=None, alias_input=False):
    """x5: (B, C, T, H, W) -> (B, C, T, H, W); dtype preserved (f32 or bf16).

    chunk_cols: force the chunked two-sweep path with this lane-chunk width
                (multiple of 128 dividing T*H*W).  Default: auto-select.
    alias_input: alias x with the output (saves an HBM allocation when x is a
                 dead intermediate inside a larger jitted model; XLA inserts a
                 copy when the input buffer must be preserved)."""
    wa, ba, wb, bb, wv, bv, wr, br = params
    B, C, T, H, W = x5.shape
    S = H * W
    L = T * S
    c_m = wa.shape[0]
    c_n = wb.shape[0]
    esize = x5.dtype.itemsize

    x = x5.reshape(B, C, L)

    # Pooling / broadcast matrices (tiny, f32, constant-folded under jit).
    # pool[t*S+s, t] = 1/S  (carries the mean divisor explicitly, so zero padding
    # of L would not perturb the mean); expand[t, t*S+s] = 1.
    eye_t = jnp.eye(T, dtype=jnp.float32)
    pool = jnp.repeat(eye_t, S, axis=0) / jnp.float32(S)     # (L, T)
    expand = jnp.repeat(eye_t, S, axis=1)                    # (T, L)

    # Fused projection weights (convA / convB / convV stacked).
    wstk = jnp.concatenate([wa, wb, wv], axis=0).astype(jnp.float32)    # (c_m+2c_n, C)
    bstk = jnp.concatenate([ba, bb, bv], axis=0).astype(jnp.float32)    # (c_m+2c_n, 1)
    wr32 = wr.astype(jnp.float32)
    br32 = br.astype(jnp.float32)

    w_bytes = 4 * (pool.size + expand.size + wstk.size + bstk.size + wr32.size + br32.size)

    def vmem_need(cols):
        blk = C * cols * esize
        need = 2 * 2 * blk                        # double-buffered x + out blocks
        need += 2 * 4 * (cols * T + T * cols)     # pool / expand blocks
        need += 2 * w_bytes                       # weight blocks
        need += 2 * C * cols * 4                  # in-kernel f32 temporaries
        need += 2 * C * T * 4                     # scratch accumulators
        return int(need)

    def vmem_clamp(need):
        return int(min(max(need + 4 * _MIB, 32 * _MIB), 128 * _MIB))

    def flops_estimate():
        per_batch = (2 * C * L * T                   # pooling matmul
                     + 2 * (c_m + 2 * c_n) * C * T   # fused projections
                     + 4 * c_m * c_n * T             # descriptors + tmpZ
                     + 2 * C * c_m * T               # reconstruct
                     + 2 * C * T * L                 # scale broadcast matmul
                     + C * L)                        # final multiply
        return int(B * per_batch)

    use_chunked = (chunk_cols is not None) or (
        vmem_need(L) > _MONO_VMEM_BUDGET and L % 128 == 0)
    io_alias = {0: 0} if alias_input else {}

    if not use_chunked:
        # TODO(synk): if the per-batch slab overflows the VMEM budget but L is not a
        # multiple of 128, zero-pad L up to a multiple of 128 so the chunked path can
        # be used (the pooling matrix already carries the 1/S normalisation, so zero
        # padding does not perturb the mean).
        cost = pl.CostEstimate(
            flops=flops_estimate(),
            transcendentals=int(2 * B * c_n * T),
            bytes_accessed=int(2 * B * C * L * esize + w_bytes),
        )
        out = pl.pallas_call(
            functools.partial(_da_kernel_full, c_m, c_n),
            out_shape=jax.ShapeDtypeStruct((B, C, L), x.dtype),
            grid_spec=pltpu.PrefetchScalarGridSpec(
                num_scalar_prefetch=0,
                grid=(B,),
                in_specs=[
                    pl.BlockSpec((1, C, L), lambda b: (b, 0, 0)),          # x
                    pl.BlockSpec((L, T), lambda b: (0, 0)),                # pool matrix
                    pl.BlockSpec((T, L), lambda b: (0, 0)),                # expand matrix
                    pl.BlockSpec((c_m + 2 * c_n, C), lambda b: (0, 0)),    # stacked conv W
                    pl.BlockSpec((c_m + 2 * c_n, 1), lambda b: (0, 0)),    # stacked conv b
                    pl.BlockSpec((C, c_m), lambda b: (0, 0)),              # reconstruct W
                    pl.BlockSpec((C, 1), lambda b: (0, 0)),                # reconstruct b
                ],
                out_specs=pl.BlockSpec((1, C, L), lambda b: (b, 0, 0)),
            ),
            compiler_params=pltpu.CompilerParams(
                dimension_semantics=("parallel",),
                vmem_limit_bytes=vmem_clamp(vmem_need(L))),
            cost_estimate=cost,
            input_output_aliases=io_alias,
        )(x, pool, expand, wstk, bstk, wr32, br32)
    else:
        if chunk_cols is not None:
            if chunk_cols % 128 != 0 or L % chunk_cols != 0:
                raise ValueError("chunk_cols must be a multiple of 128 dividing T*H*W")
            lc = chunk_cols
        else:
            lc = 128
            for k in range(L // 128, 0, -1):
                cand = 128 * k
                if L % cand == 0 and vmem_need(cand) <= _CHUNK_VMEM_TARGET:
                    lc = cand
                    break
        n_chunks = L // lc

        cost = pl.CostEstimate(
            flops=flops_estimate(),
            transcendentals=int(2 * B * c_n * T),
            bytes_accessed=int(3 * B * C * L * esize + w_bytes),   # x read twice
        )
        out = pl.pallas_call(
            functools.partial(_da_kernel_chunked, c_m, c_n),
            out_shape=jax.ShapeDtypeStruct((B, C, L), x.dtype),
            grid_spec=pltpu.PrefetchScalarGridSpec(
                num_scalar_prefetch=0,
                grid=(B, 2, n_chunks),
                in_specs=[
                    pl.BlockSpec((1, C, lc), lambda b, p, j: (b, 0, j)),        # x chunk
                    pl.BlockSpec((lc, T), lambda b, p, j: ((1 - p) * j, 0)),    # pool chunk
                    pl.BlockSpec((T, lc), lambda b, p, j: (0, p * j)),          # expand chunk
                    pl.BlockSpec((c_m + 2 * c_n, C), lambda b, p, j: (0, 0)),
                    pl.BlockSpec((c_m + 2 * c_n, 1), lambda b, p, j: (0, 0)),
                    pl.BlockSpec((C, c_m), lambda b, p, j: (0, 0)),
                    pl.BlockSpec((C, 1), lambda b, p, j: (0, 0)),
                ],
                # Phase 0 parks the output window on chunk 0 (never written nor
                # flushed there); phase 1 streams the real per-chunk outputs.
                out_specs=pl.BlockSpec((1, C, lc), lambda b, p, j: (b, 0, p * j)),
                scratch_shapes=[pltpu.VMEM((C, T), jnp.float32),    # pooled-sum accumulator
                                pltpu.VMEM((C, T), jnp.float32)],   # per-batch scale
            ),
            compiler_params=pltpu.CompilerParams(
                dimension_semantics=("parallel", "arbitrary", "arbitrary"),
                vmem_limit_bytes=vmem_clamp(vmem_need(lc))),
            cost_estimate=cost,
            input_output_aliases=io_alias,
        )(x, pool, expand, wstk, bstk, wr32, br32)

    return out.reshape(B, C, T, H, W)


def init_params(key, in_channels):
    """Deterministic PyTorch-style init (uniform +-1/sqrt(fan_in))."""
    c_m = in_channels // 4
    c_n = in_channels // 4
    ks = jax.random.split(key, 8)

    def u(k, shape, fan_in):
        bound = 1.0 / jnp.sqrt(jnp.float32(fan_in))
        return jax.random.uniform(k, shape, jnp.float32, -bound, bound)

    wa = u(ks[0], (c_m, in_channels), in_channels)
    ba = u(ks[1], (c_m, 1), in_channels)
    wb = u(ks[2], (c_n, in_channels), in_channels)
    bb = u(ks[3], (c_n, 1), in_channels)
    wv = u(ks[4], (c_n, in_channels), in_channels)
    bv = u(ks[5], (c_n, 1), in_channels)
    wr = u(ks[6], (in_channels, c_m), c_m)
    br = u(ks[7], (in_channels, 1), c_m)
    return (wa, ba, wb, bb, wv, bv, wr, br)


def reference(x5, params):
    """Pure-JAX reference following the PyTorch op order exactly (conv -> pool)."""
    wa, ba, wb, bb, wv, bv, wr, br = params

    def conv_pool(w, b):
        y = jnp.einsum('mc,bcthw->bmthw', w, x5) + b.reshape(1, -1, 1, 1, 1)
        return y.mean(axis=(3, 4))                                 # (B, m, T)

    A = conv_pool(wa, ba)
    Bm = conv_pool(wb, bb)
    V = conv_pool(wv, bv)
    att_maps = jax.nn.softmax(Bm, axis=-1)
    gd = jnp.einsum('bmt,bnt->bmn', A, att_maps)
    att_vec = jax.nn.softmax(V, axis=1)
    Z = jnp.einsum('bmn,bnt->bmt', gd, att_vec)
    scale = jnp.einsum('cm,bmt->bct', wr, Z) + br.reshape(1, -1, 1)
    return x5 * scale[:, :, :, None, None]


if __name__ == "__main__":
    B, C, T, H, W = 2, 32, 8, 8, 8          # in_channels=32 -> c_m = c_n = 8, L = 512
    key = jax.random.PRNGKey(0)
    kx, kp = jax.random.split(key)
    x = jax.random.normal(kx, (B, C, T, H, W), jnp.float32)
    params = init_params(kp, C)

    ref = reference(x, params)

    # 1) Single-pass path (per-batch slab resident in VMEM), f32 I/O.
    out = jax.block_until_ready(double_attention(x, params))
    assert out.shape == ref.shape and out.dtype == ref.dtype
    assert jnp.allclose(out, ref, rtol=2e-4, atol=2e-4), "monolithic f32 mismatch"

    # 2) Chunked two-sweep path (auto-selected when the per-batch slab would
    #    overflow VMEM, e.g. large C / spatial on v7x); forced here via chunk_cols.
    out_c = jax.block_until_ready(double_attention(x, params, chunk_cols=128))
    assert jnp.allclose(out_c, ref, rtol=2e-4, atol=2e-4), "chunked f32 mismatch"

    # 3) bf16 I/O (halves HBM traffic for this bandwidth-bound kernel); compute
    #    stays f32 inside the kernel.  Also exercises input/output aliasing.
    x_bf16 = x.astype(jnp.bfloat16)
    ref_bf16 = reference(x_bf16.astype(jnp.float32), params)
    out_b = jax.block_until_ready(double_attention(x_bf16, params, alias_input=True))
    assert out_b.dtype == jnp.bfloat16
    assert jnp.allclose(out_b.astype(jnp.float32), ref_bf16, rtol=2e-2, atol=2e-2), \
        "bf16 mismatch"

    print("KERNEL_OK")
</pallas_src>

<mosaic_0001>
module attributes {stable_mosaic.version = 11 : i64} {
  func.func @_da_kernel_full(%arg0: i32, %arg1: memref<1x32x512xf32, #tpu.memory_space<vmem>>, %arg2: memref<512x8xf32, #tpu.memory_space<vmem>>, %arg3: memref<8x512xf32, #tpu.memory_space<vmem>>, %arg4: memref<24x32xf32, #tpu.memory_space<vmem>>, %arg5: memref<24x1xf32, #tpu.memory_space<vmem>>, %arg6: memref<32x8xf32, #tpu.memory_space<vmem>>, %arg7: memref<32x1xf32, #tpu.memory_space<vmem>>, %arg8: memref<1x32x512xf32, #tpu.memory_space<vmem>>) attributes {dimension_semantics = [#tpu.dimension_semantics<parallel>], iteration_bounds = array<i64: 2>, scalar_prefetch = 0 : i64, scratch_operands = 0 : i64, tpu.core_type = #tpu.core_type<tc>, window_params = [{transform_indices = @transform_0, window_bounds = array<i64: 1, 32, 512>}, {pipeline_mode = #tpu.pipeline_mode<synchronous>, transform_indices = @transform_1, window_bounds = array<i64: 512, 8>}, {pipeline_mode = #tpu.pipeline_mode<synchronous>, transform_indices = @transform_2, window_bounds = array<i64: 8, 512>}, {pipeline_mode = #tpu.pipeline_mode<synchronous>, transform_indices = @transform_3, window_bounds = array<i64: 24, 32>}, {pipeline_mode = #tpu.pipeline_mode<synchronous>, transform_indices = @transform_4, window_bounds = array<i64: 24, 1>}, {pipeline_mode = #tpu.pipeline_mode<synchronous>, transform_indices = @transform_5, window_bounds = array<i64: 32, 8>}, {pipeline_mode = #tpu.pipeline_mode<synchronous>, transform_indices = @transform_6, window_bounds = array<i64: 32, 1>}, {transform_indices = @transform_7, window_bounds = array<i64: 1, 32, 512>}]} {
    %c0 = arith.constant 0 : index
    %c0_0 = arith.constant 0 : index
    %c0_1 = arith.constant 0 : index
    %0 = vector.load %arg1[%c0, %c0_0, %c0_1] : memref<1x32x512xf32, #tpu.memory_space<vmem>>, vector<1x32x512xf32>
    %1 = vector.shape_cast %0 : vector<1x32x512xf32> to vector<32x512xf32>
    %c0_2 = arith.constant 0 : index
    %c0_3 = arith.constant 0 : index
    %2 = vector.load %arg2[%c0_2, %c0_3] : memref<512x8xf32, #tpu.memory_space<vmem>>, vector<512x8xf32>
    %cst = arith.constant dense<0.000000e+00> : vector<32x8xf32>
    %3 = tpu.matmul %1, %2, %cst {dimension_numbers = #tpu.dot_dimension_numbers<[1], [0], [0], [1], [0, 0, 1, 1], [], []>} : vector<32x512xf32>, vector<512x8xf32>, vector<32x8xf32> -> vector<32x8xf32>
    %c0_4 = arith.constant 0 : index
    %c0_5 = arith.constant 0 : index
    %4 = vector.load %arg4[%c0_4, %c0_5] : memref<24x32xf32, #tpu.memory_space<vmem>>, vector<24x32xf32>
    %c0_6 = arith.constant 0 : index
    %c0_7 = arith.constant 0 : index
    %5 = vector.load %arg5[%c0_6, %c0_7] : memref<24x1xf32, #tpu.memory_space<vmem>>, vector<24x1xf32>
    %c0_8 = arith.constant 0 : index
    %c0_9 = arith.constant 0 : index
    %6 = vector.load %arg6[%c0_8, %c0_9] : memref<32x8xf32, #tpu.memory_space<vmem>>, vector<32x8xf32>
    %c0_10 = arith.constant 0 : index
    %c0_11 = arith.constant 0 : index
    %7 = vector.load %arg7[%c0_10, %c0_11] : memref<32x1xf32, #tpu.memory_space<vmem>>, vector<32x1xf32>
    %cst_12 = arith.constant dense<0.000000e+00> : vector<24x8xf32>
    %8 = tpu.matmul %4, %3, %cst_12 {dimension_numbers = #tpu.dot_dimension_numbers<[1], [0], [0], [1], [0, 0, 1, 1], [], []>} : vector<24x32xf32>, vector<32x8xf32>, vector<24x8xf32> -> vector<24x8xf32>
    %9 = vector.broadcast %5 : vector<24x1xf32> to vector<24x8xf32>
    %10 = arith.addf %8, %9 : vector<24x8xf32>
    %11 = vector.extract_strided_slice %10 {offsets = [0, 0], sizes = [8, 8], strides = [1, 1]} : vector<24x8xf32> to vector<8x8xf32>
    %12 = vector.extract_strided_slice %10 {offsets = [8, 0], sizes = [8, 8], strides = [1, 1]} : vector<24x8xf32> to vector<8x8xf32>
    %13 = vector.extract_strided_slice %10 {offsets = [16, 0], sizes = [8, 8], strides = [1, 1]} : vector<24x8xf32> to vector<8x8xf32>
    %cst_13 = arith.constant dense<0xFF800000> : vector<8xf32>
    %14 = vector.multi_reduction <maximumf>, %12, %cst_13 [1] : vector<8x8xf32> to vector<8xf32>
    %15 = vector.shape_cast %14 : vector<8xf32> to vector<8x1xf32>
    %16 = vector.broadcast %15 : vector<8x1xf32> to vector<8x8xf32>
    %17 = arith.subf %12, %16 : vector<8x8xf32>
    %18 = math.exp %17 : vector<8x8xf32>
    %cst_14 = arith.constant dense<0.000000e+00> : vector<8xf32>
    %19 = vector.multi_reduction <add>, %18, %cst_14 [1] : vector<8x8xf32> to vector<8xf32>
    %20 = vector.shape_cast %19 : vector<8xf32> to vector<8x1xf32>
    %21 = tpu.reciprocal %20 : vector<8x1xf32> -> vector<8x1xf32>
    %22 = vector.broadcast %21 : vector<8x1xf32> to vector<8x8xf32>
    %23 = arith.mulf %18, %22 : vector<8x8xf32>
    %cst_15 = arith.constant dense<0xFF800000> : vector<8xf32>
    %24 = vector.multi_reduction <maximumf>, %13, %cst_15 [0] : vector<8x8xf32> to vector<8xf32>
    %25 = vector.shape_cast %24 : vector<8xf32> to vector<1x8xf32>
    %26 = vector.broadcast %25 : vector<1x8xf32> to vector<8x8xf32>
    %27 = arith.subf %13, %26 : vector<8x8xf32>
    %28 = math.exp %27 : vector<8x8xf32>
    %cst_16 = arith.constant dense<0.000000e+00> : vector<8xf32>
    %29 = vector.multi_reduction <add>, %28, %cst_16 [0] : vector<8x8xf32> to vector<8xf32>
    %30 = vector.shape_cast %29 : vector<8xf32> to vector<1x8xf32>
    %31 = tpu.reciprocal %30 : vector<1x8xf32> -> vector<1x8xf32>
    %32 = vector.broadcast %31 : vector<1x8xf32> to vector<8x8xf32>
    %33 = arith.mulf %28, %32 : vector<8x8xf32>
    %cst_17 = arith.constant dense<0.000000e+00> : vector<8x8xf32>
    %34 = tpu.matmul %11, %23, %cst_17 {dimension_numbers = #tpu.dot_dimension_numbers<[1], [1], [0], [0], [0, 0, 1, 0], [], []>} : vector<8x8xf32>, vector<8x8xf32>, vector<8x8xf32> -> vector<8x8xf32>
    %cst_18 = arith.constant dense<0.000000e+00> : vector<8x8xf32>
    %35 = tpu.matmul %34, %33, %cst_18 {dimension_numbers = #tpu.dot_dimension_numbers<[1], [0], [0], [1], [0, 0, 1, 1], [], []>} : vector<8x8xf32>, vector<8x8xf32>, vector<8x8xf32> -> vector<8x8xf32>
    %cst_19 = arith.constant dense<0.000000e+00> : vector<32x8xf32>
    %36 = tpu.matmul %6, %35, %cst_19 {dimension_numbers = #tpu.dot_dimension_numbers<[1], [0], [0], [1], [0, 0, 1, 1], [], []>} : vector<32x8xf32>, vector<8x8xf32>, vector<32x8xf32> -> vector<32x8xf32>
    %37 = vector.broadcast %7 : vector<32x1xf32> to vector<32x8xf32>
    %38 = arith.addf %36, %37 : vector<32x8xf32>
    %c0_20 = arith.constant 0 : index
    %c0_21 = arith.constant 0 : index
    %39 = vector.load %arg3[%c0_20, %c0_21] : memref<8x512xf32, #tpu.memory_space<vmem>>, vector<8x512xf32>
    %cst_22 = arith.constant dense<0.000000e+00> : vector<32x512xf32>
    %40 = tpu.matmul %38, %39, %cst_22 {dimension_numbers = #tpu.dot_dimension_numbers<[1], [0], [0], [1], [0, 0, 1, 1], [], []>} : vector<32x8xf32>, vector<8x512xf32>, vector<32x512xf32> -> vector<32x512xf32>
    %41 = arith.mulf %1, %40 : vector<32x512xf32>
    %c0_23 = arith.constant 0 : index
    %c0_24 = arith.constant 0 : index
    %c0_25 = arith.constant 0 : index
    %42 = vector.load %arg8[%c0_23, %c0_24, %c0_25] : memref<1x32x512xf32, #tpu.memory_space<vmem>>, vector<1x32x512xf32>
    %43 = vector.shape_cast %42 : vector<1x32x512xf32> to vector<32x512xf32>
    %44 = vector.shape_cast %41 : vector<32x512xf32> to vector<1x32x512xf32>
    tpu.vector_store %arg8[%c0_23, %c0_24, %c0_25], %44 {strides = array<i32>} : memref<1x32x512xf32, #tpu.memory_space<vmem>>, vector<1x32x512xf32>,
    return
  }
  func.func @transform_0(%arg0: i32) -> (i32, i32, i32) {
    %c0_i32 = arith.constant 0 : i32
    %c0_i32_0 = arith.constant 0 : i32
    %c0_i32_1 = arith.constant 0 : i32
    return %arg0, %c0_i32, %c0_i32_0 : i32, i32, i32
  }
  func.func @transform_1(%arg0: i32) -> (i32, i32) {
    %c0_i32 = arith.constant 0 : i32
    %c0_i32_0 = arith.constant 0 : i32
    %c0_i32_1 = arith.constant 0 : i32
    return %c0_i32, %c0_i32_0 : i32, i32
  }
  func.func @transform_2(%arg0: i32) -> (i32, i32) {
    %c0_i32 = arith.constant 0 : i32
    %c0_i32_0 = arith.constant 0 : i32
    %c0_i32_1 = arith.constant 0 : i32
    return %c0_i32, %c0_i32_0 : i32, i32
  }
  func.func @transform_3(%arg0: i32) -> (i32, i32) {
    %c0_i32 = arith.constant 0 : i32
    %c0_i32_0 = arith.constant 0 : i32
    %c0_i32_1 = arith.constant 0 : i32
    return %c0_i32, %c0_i32_0 : i32, i32
  }
  func.func @transform_4(%arg0: i32) -> (i32, i32) {
    %c0_i32 = arith.constant 0 : i32
    %c0_i32_0 = arith.constant 0 : i32
    %c0_i32_1 = arith.constant 0 : i32
    return %c0_i32, %c0_i32_0 : i32, i32
  }
  func.func @transform_5(%arg0: i32) -> (i32, i32) {
    %c0_i32 = arith.constant 0 : i32
    %c0_i32_0 = arith.constant 0 : i32
    %c0_i32_1 = arith.constant 0 : i32
    return %c0_i32, %c0_i32_0 : i32, i32
  }
  func.func @transform_6(%arg0: i32) -> (i32, i32) {
    %c0_i32 = arith.constant 0 : i32
    %c0_i32_0 = arith.constant 0 : i32
    %c0_i32_1 = arith.constant 0 : i32
    return %c0_i32, %c0_i32_0 : i32, i32
  }
  func.func @transform_7(%arg0: i32) -> (i32, i32, i32) {
    %c0_i32 = arith.constant 0 : i32
    %c0_i32_0 = arith.constant 0 : i32
    %c0_i32_1 = arith.constant 0 : i32
    return %arg0, %c0_i32, %c0_i32_0 : i32, i32, i32
  }
}

</mosaic_0001>

<bundles_post_ra>
// kernel: double_attention.1
= control target key start
LH: loop header
LB: loop body
LE: loop exit
PB: predicated region body
PF: predicated region fallthrough
CT: control target
= control target key end

     0   :  { %s1540_s24 = smov 0   ;;  %s1959_s0 = inlined_call_operand.vmem [shape: f32[2,32,512], index: 0, kind: input, shape index: {}]   ;;  %s1960_s1 = inlined_call_operand.vmem [shape: f32[512,8], index: 1, kind: input, shape index: {}]   ;;  %s1961_s2 = inlined_call_operand.vmem [shape: f32[8,512], index: 2, kind: input, shape index: {}]   ;;  %s1962_s3 = inlined_call_operand.vmem [shape: f32[24,32], index: 3, kind: input, shape index: {}]   ;;  %s1963_s4 = inlined_call_operand.vmem [shape: f32[24,1], index: 4, kind: input, shape index: {}]   ;;  %s1964_s5 = inlined_call_operand.vmem [shape: f32[32,8], index: 5, kind: input, shape index: {}]   ;;  %s1965_s6 = inlined_call_operand.vmem [shape: f32[32,1], index: 6, kind: input, shape index: {}]   ;;  %s1966_s7 = inlined_call_operand.vmem [shape: f32[2,32,512], index: 7, kind: output, shape index: {}]  }
   0x1 LB: > { %s1226_s25 = sadd.s32 4294967295, %s1494_s24   ;;  %p1230_p0 = scmp.ge.s32.totalorder %s1494_s24, 1  ;;  %s1494_s24 = sphi %s1540_s24, %s17_s24  }
   0x2   : > { %p237_p1 = scmp.lt.s32.totalorder %s1494_s24, 3 }
   0x4   : > { %p238_p2 = pnand %p1230_p0, %p237_p1 }
   0x5   : > { %v311_v0 = vld [vmem:[%s1960_s1 + $0x80] sm:$0xff] (!%p238_p2)  ;;  %v312_v1 = vld [vmem:[%s1960_s1 + $0x88] sm:$0xff] (!%p238_p2)  ;;  %v313_v11 = vld [vmem:[%s1960_s1 + $0x90] sm:$0xff] (!%p238_p2)  ;;  %p1622_p3 = scmp.lt.s32.totalorder (!%p238_p2), %s1226_s25, 1  ;;  %vm1497_vm0 = vmmov (!%p238_p2), 0   ;;  %vm558_vm1 = vcmask (!%p238_p2), 261120  }
   0x6   : > { %241 = sbr.rel (%p238_p2) target bundleno = 1680 (0x690), region = 48  ;;  %v343_v2 = vld [vmem:[%s1960_s1 + $0x180] sm:$0xff] (!%p238_p2)  ;;  %v1396_v3 = vpack.c.bf16 (!%p238_p2), %v312_v1, %v311_v0  ;;  %v344_v4 = vld [vmem:[%s1960_s1 + $0x188] sm:$0xff] (!%p238_p2)  ;;  %v314_v13 = vld [vmem:[%s1960_s1 + $0x98] sm:$0xff] (!%p238_p2)  ;;  %vm648_vm2 = vcmask (!%p238_p2), 64512  }
   0x7   : > { %v295_v5 = vld [vmem:[%s1960_s1] sm:$0xff] (!%p238_p2)  ;;  %v296_v6 = vld [vmem:[%s1960_s1 + $0x8] sm:$0xff] (!%p238_p2)  ;;  %v1428_v7 = vpack.c.bf16 (!%p238_p2), %v344_v4, %v343_v2  ;;  %v345_v14 = vld [vmem:[%s1960_s1 + $0x190] sm:$0xff] (!%p238_p2)  ;;  %v1400_v16 = vpack.c.bf16 (!%p238_p2), %v314_v13, %v313_v11 }
   0x8   : > { %v1398_v8 = vpack.c.bf16 (!%p238_p2), %v296_v6, %v295_v5  ;;  %v327_v9 = vld [vmem:[%s1960_s1 + $0x100] sm:$0xff] (!%p238_p2)  ;;  %v328_v10 = vld [vmem:[%s1960_s1 + $0x108] sm:$0xff] (!%p238_p2)  ;;  %1397 = vmatprep.subr.bf16.mxu0 (!%p238_p2), %v1396_v3  ;;  %v346_v15 = vld [vmem:[%s1960_s1 + $0x198] sm:$0xff] (!%p238_p2) }
   0x9   : > { %v1430_v12 = vpack.c.bf16 (!%p238_p2), %v328_v10, %v327_v9  ;;  %1429 = vmatprep.subr.bf16.mxu1 (!%p238_p2), %v1428_v7  ;;  %v1432_v17 = vpack.c.bf16 (!%p238_p2), %v346_v15, %v345_v14  ;;  %v297_v18 = vld [vmem:[%s1960_s1 + $0x10] sm:$0xff] (!%p238_p2)  ;;  %v298_v19 = vld [vmem:[%s1960_s1 + $0x18] sm:$0xff] (!%p238_p2)  ;;  %v315_v23 = vld [vmem:[%s1960_s1 + $0xa0] sm:$0xff] (!%p238_p2) }
   0xa   : > { %1399 = vmatpush3.bf16.msra.mxu0 (!%p238_p2), %v1398_v8  ;;  %v329_v20 = vld [vmem:[%s1960_s1 + $0x110] sm:$0xff] (!%p238_p2)  ;;  %v1402_v21 = vpack.c.bf16 (!%p238_p2), %v298_v19, %v297_v18  ;;  %v330_v22 = vld [vmem:[%s1960_s1 + $0x118] sm:$0xff] (!%p238_p2)  ;;  %v316_v24 = vld [vmem:[%s1960_s1 + $0xa8] sm:$0xff] (!%p238_p2) }
   0xb   : > { %1431 = vmatpush3.bf16.msra.mxu1 (!%p238_p2), %v1430_v12  ;;  %1401 = vmatprep.subr.bf16.mxu0 (!%p238_p2), %v1400_v16  ;;  %v1434_v25 = vpack.c.bf16 (!%p238_p2), %v330_v22, %v329_v20  ;;  %v1404_v26 = vpack.c.bf16 (!%p238_p2), %v316_v24, %v315_v23  ;;  %v347_v27 = vld [vmem:[%s1960_s1 + $0x1a0] sm:$0xff] (!%p238_p2)  ;;  %v348_v28 = vld [vmem:[%s1960_s1 + $0x1a8] sm:$0xff] (!%p238_p2)  ;;  %v317_v35 = vld [vmem:[%s1960_s1 + $0xb0] sm:$0xff] (!%p238_p2) }
   0xc   : > { %1433 = vmatprep.subr.bf16.mxu1 (!%p238_p2), %v1432_v17  ;;  %v299_v29 = vld [vmem:[%s1960_s1 + $0x20] sm:$0xff] (!%p238_p2)  ;;  %v1436_v30 = vpack.c.bf16 (!%p238_p2), %v348_v28, %v347_v27  ;;  %v300_v31 = vld [vmem:[%s1960_s1 + $0x28] sm:$0xff] (!%p238_p2)  ;;  %v318_v36 = vld [vmem:[%s1960_s1 + $0xb8] sm:$0xff] (!%p238_p2) }
   0xd   : > { %v331_v32 = vld [vmem:[%s1960_s1 + $0x120] sm:$0xff]  ;;  %v332_v33 = vld [vmem:[%s1960_s1 + $0x128] sm:$0xff]  ;;  %v1406_v34 = vpack.c.bf16 %v300_v31, %v299_v29  ;;  %v349_v37 = vld [vmem:[%s1960_s1 + $0x1b0] sm:$0xff]  ;;  %v1408_v39 = vpack.c.bf16 %v318_v36, %v317_v35  ;;  %s1969_s25 = smov (!%p1622_p3, %s1226_s25), 1 }
   0xe   : > { %1403 = vmatpush3.bf16.msra.mxu0 %v1402_v21  ;;  %v1438_v38 = vpack.c.bf16 %v332_v33, %v331_v32  ;;  %v350_v40 = vld [vmem:[%s1960_s1 + $0x1b8] sm:$0xff]  ;;  %v301_v41 = vld [vmem:[%s1960_s1 + $0x30] sm:$0xff]  ;;  %v319_v46 = vld [vmem:[%s1960_s1 + $0xc0] sm:$0xff]  ;;  %s1255_s8 = sshll.u32 %s1969_s25, 7 }
   0xf   : > { %1435 = vmatpush3.bf16.msra.mxu1 %v1434_v25  ;;  %1405 = vmatprep.subr.bf16.mxu0 %v1404_v26  ;;  %v302_v42 = vld [vmem:[%s1960_s1 + $0x38] sm:$0xff]  ;;  %v1440_v43 = vpack.c.bf16 %v350_v40, %v349_v37  ;;  %v333_v44 = vld [vmem:[%s1960_s1 + $0x130] sm:$0xff]  ;;  %v320_v47 = vld [vmem:[%s1960_s1 + $0xc8] sm:$0xff]  ;;  %s1716_s23 = scalar_lea.vmem %s1959_s0, %s1255_s8  ;;  %s1922_s12 = scalar_lea.vmem %s1966_s7, %s1255_s8 }
  0x10   : > { %1437 = vmatprep.subr.bf16.mxu1 %v1436_v30  ;;  %v334_v45 = vld [vmem:[%s1960_s1 + $0x138] sm:$0xff]  ;;  %v351_v48 = vld [vmem:[%s1960_s1 + $0x1c0] sm:$0xff]  ;;  %v352_v49 = vld [vmem:[%s1960_s1 + $0x1c8] sm:$0xff]  ;;  %v1410_v50 = vpack.c.bf16 %v302_v42, %v301_v41  ;;  %v1412_v52 = vpack.c.bf16 %v320_v47, %v319_v46 }
  0x11   : > { %v1442_v51 = vpack.c.bf16 %v334_v45, %v333_v44  ;;  %v303_v53 = vld [vmem:[%s1960_s1 + $0x40] sm:$0xff]  ;;  %v304_v54 = vld [vmem:[%s1960_s1 + $0x48] sm:$0xff]  ;;  %v1444_v56 = vpack.c.bf16 %v352_v49, %v351_v48  ;;  %v321_v58 = vld [vmem:[%s1960_s1 + $0xd0] sm:$0xff]  ;;  %v1496_v48 = vmov 0.0|0.0   ;;  %v1498_v49 = vmov 0.0  }
  0x12   : > { %1407 = vmatpush3.bf16.msra.mxu0 %v1406_v34  ;;  %v335_v55 = vld [vmem:[%s1960_s1 + $0x140] sm:$0xff]  ;;  %v336_v57 = vld [vmem:[%s1960_s1 + $0x148] sm:$0xff]  ;;  %v322_v59 = vld [vmem:[%s1960_s1 + $0xd8] sm:$0xff]  ;;  %v1414_v62 = vpack.c.bf16 %v304_v54, %v303_v53 }
  0x13   : > { %1439 = vmatpush3.bf16.msra.mxu1 %v1438_v38  ;;  %1409 = vmatprep.subr.bf16.mxu0 %v1408_v39  ;;  %v353_v60 = vld [vmem:[%s1960_s1 + $0x1d0] sm:$0xff]  ;;  %v354_v61 = vld [vmem:[%s1960_s1 + $0x1d8] sm:$0xff]  ;;  %v1446_v63 = vpack.c.bf16 %v336_v57, %v335_v55  ;;  %v1416_v0 = vpack.c.bf16 %v322_v59, %v321_v58  ;;  %v323_v6 = vld [vmem:[%s1960_s1 + $0xe0] sm:$0xff] }
  0x14   : > { %1441 = vmatprep.subr.bf16.mxu1 %v1440_v43  ;;  %v305_v1 = vld [vmem:[%s1960_s1 + $0x50] sm:$0xff]  ;;  %v306_v2 = vld [vmem:[%s1960_s1 + $0x58] sm:$0xff]  ;;  %v1448_v4 = vpack.c.bf16 %v354_v61, %v353_v60  ;;  %v324_v7 = vld [vmem:[%s1960_s1 + $0xe8] sm:$0xff] }
  0x15   : > { %v337_v3 = vld [vmem:[%s1960_s1 + $0x150] sm:$0xff]  ;;  %v338_v5 = vld [vmem:[%s1960_s1 + $0x158] sm:$0xff]  ;;  %v355_v8 = vld [vmem:[%s1960_s1 + $0x1e0] sm:$0xff]  ;;  %v1418_v10 = vpack.c.bf16 %v306_v2, %v305_v1  ;;  %v1420_v14 = vpack.c.bf16 %v324_v7, %v323_v6 }
  0x16   : > { %1411 = vmatpush3.bf16.msra.mxu0 %v1410_v50  ;;  %v356_v9 = vld [vmem:[%s1960_s1 + $0x1e8] sm:$0xff]  ;;  %v307_v11 = vld [vmem:[%s1960_s1 + $0x60] sm:$0xff]  ;;  %v1450_v13 = vpack.c.bf16 %v338_v5, %v337_v3  ;;  %v1737_v17 = vld [vmem:[%s1716_s23 + $0x18] sm:$0xff] }
  0x17   : > { %1443 = vmatpush3.bf16.msra.mxu1 %v1442_v51  ;;  %1413 = vmatprep.subr.bf16.mxu0 %v1412_v52  ;;  %v308_v12 = vld [vmem:[%s1960_s1 + $0x68] sm:$0xff]  ;;  %v339_v15 = vld [vmem:[%s1960_s1 + $0x160] sm:$0xff]  ;;  %v1452_v18 = vpack.c.bf16 %v356_v9, %v355_v8  ;;  %v325_v20 = vld [vmem:[%s1960_s1 + $0xf0] sm:$0xff]  ;;  %v1499_v51 = vmov 0  }
  0x18   : > { %1445 = vmatprep.subr.bf16.mxu1 %v1444_v56  ;;  %v1734_v16 = vld [vmem:[%s1716_s23 + $0x8] sm:$0xff]  ;;  %v326_v21 = vld [vmem:[%s1960_s1 + $0xf8] sm:$0xff]  ;;  %v357_v22 = vld [vmem:[%s1960_s1 + $0x1f0] sm:$0xff]  ;;  %508 = vmatprep.mubr.f32.mxu1 %v1737_v17  ;;  %v1422_v24 = vpack.c.bf16 %v308_v12, %v307_v11 }
  0x19   : > { %v340_v19 = vld [vmem:[%s1960_s1 + $0x168] sm:$0xff]  ;;  %423 = vmatprep.mubr.f32.mxu0 %v1734_v16  ;;  %v358_v23 = vld [vmem:[%s1960_s1 + $0x1f8] sm:$0xff]  ;;  %v1424_v26 = vpack.c.bf16 %v326_v21, %v325_v20  ;;  %v309_v27 = vld [vmem:[%s1960_s1 + $0x70] sm:$0xff]  ;;  %1478 = vset.pattern.permute.xlu0 %v1499_v51 }
  0x1a   : > { %1415 = vmatpush3.bf16.msra.mxu0 %v1414_v62  ;;  %v1454_v25 = vpack.c.bf16 %v340_v19, %v339_v15  ;;  %v310_v28 = vld [vmem:[%s1960_s1 + $0x78] sm:$0xff]  ;;  %v1456_v29 = vpack.c.bf16 %v358_v23, %v357_v22  ;;  %v341_v30 = vld [vmem:[%s1960_s1 + $0x170] sm:$0xff]  ;;  %v1769_v34 = vld [vmem:[%s1716_s23] sm:$0xff]  ;;  %1479 = vset.pattern.permute.xlu1 %v1499_v51 }
  0x1b   : > { %1447 = vmatpush3.bf16.msra.mxu1 %v1446_v63  ;;  %1417 = vmatprep.subr.bf16.mxu0 %v1416_v0  ;;  %v342_v31 = vld [vmem:[%s1960_s1 + $0x178] sm:$0xff]  ;;  %v1426_v32 = vpack.c.bf16 %v310_v28, %v309_v27  ;;  %v1772_v35 = vld [vmem:[%s1716_s23 + $0x10] sm:$0xff]  ;;  %v1775_v36 = vld [vmem:[%s1716_s23 + $0x28] sm:$0xff] }
  0x1c   : > { %1449 = vmatprep.subr.bf16.mxu1 %v1448_v4  ;;  %v1458_v33 = vpack.c.bf16 %v342_v31, %v341_v30  ;;  %v1778_v37 = vld [vmem:[%s1716_s23 + $0x38] sm:$0xff]  ;;  %v1784_v38 = vld [vmem:[%s1716_s23 + $0x20] sm:$0xff]  ;;  %v1788_v39 = vld [vmem:[%s1716_s23 + $0x30] sm:$0xff] }
  0x1d   : > { %v1791_v40 = vld [vmem:[%s1716_s23 + $0x48] sm:$0xff]  ;;  %v1794_v41 = vld [vmem:[%s1716_s23 + $0x58] sm:$0xff]  ;;  %v1800_v42 = vld [vmem:[%s1716_s23 + $0x40] sm:$0xff] }
  0x1e   : > { %1419 = vmatpush3.bf16.msra.mxu0 %v1418_v10  ;;  %v1804_v43 = vld [vmem:[%s1716_s23 + $0x50] sm:$0xff]  ;;  %v1807_v44 = vld [vmem:[%s1716_s23 + $0x68] sm:$0xff]  ;;  %v1810_v45 = vld [vmem:[%s1716_s23 + $0x78] sm:$0xff] }
  0x1f   : > { %1451 = vmatpush3.bf16.msra.mxu1 %v1450_v13  ;;  %1421 = vmatprep.subr.bf16.mxu0 %v1420_v14  ;;  %v1816_v46 = vld [vmem:[%s1716_s23 + $0x60] sm:$0xff]  ;;  %v1820_v47 = vld [vmem:[%s1716_s23 + $0x70] sm:$0xff]  ;;  %v533_v50 = vld [vmem:[%s1963_s4 + $0x8] sm:$0xff] }
  0x20   : > { %1453 = vmatprep.subr.bf16.mxu1 %v1452_v18  ;;  %550 = vperm.xlu0 %1478, %v533_v50   ;;  %v529_v20 = vld [vmem:[%s1962_s3] sm:$0xff]  ;;  %v530_v21 = vld [vmem:[%s1962_s3 + $0x8] sm:$0xff]  ;;  %v531_v22 = vld [vmem:[%s1962_s3 + $0x10] sm:$0xff] }
  0x21   : > { %v542_v30 = vld [vmem:[%s1965_s6 + $0x18] sm:$0xff]  ;;  %v532_v51 = vld [vmem:[%s1963_s4] sm:$0xff] }
  0x22   : > { %1423 = vmatpush3.bf16.msra.mxu0 %v1422_v24 }
  0x23   : > { %1455 = vmatpush3.bf16.msra.mxu1 %v1454_v25  ;;  %1425 = vmatprep.subr.bf16.mxu0 %v1424_v26 }
  0x24   : > { %1457 = vmatprep.subr.bf16.mxu1 %v1456_v29 }
  0x26   : > { %1427 = vmatpush3.bf16.msra.mxu0 %v1426_v32 }
  0x27   : > { %1459 = vmatpush3.bf16.msra.mxu1 %v1458_v33  ;;  %1460 = vmatprep.subr.bf16.mxu0 %v1496_v48 }
  0x28   : > { %1378 = vmatprep.subr.mxu1 %v1498_v49 }
  0x29   : > { %424 = vmatmul.mubr.f32.vlgmr.msra.gmra.mrb[0].mxu0 %v1769_v34 }
  0x2a   : > { %509 = vmatmul.mubr.f32.vlgmr.msra.gmra.mrb[0].mxu1 %v1772_v35  ;;  %428 = vmatprep.mubr.f32.mxu0 %v1775_v36 }
  0x2b   : > { %513 = vmatprep.mubr.f32.mxu1 %v1778_v37 }
  0x2d   : > { %429 = vmatmul.mubr.f32.gmra.mrb[2].mxu0 %v1784_v38 }
  0x2e   : > { %514 = vmatmul.mubr.f32.gmra.mrb[2].mxu1 %v1788_v39  ;;  %433 = vmatprep.mubr.f32.mxu0 %v1791_v40 }
  0x2f   : > { %518 = vmatprep.mubr.f32.mxu1 %v1794_v41 }
  0x31   : > { %434 = vmatmul.mubr.f32.gmra.mrb[4].mxu0 %v1800_v42 }
  0x32   : > { %519 = vmatmul.mubr.f32.gmra.mrb[4].mxu1 %v1804_v43  ;;  %438 = vmatprep.mubr.f32.mxu0 %v1807_v44 }
  0x33   : > { %523 = vmatprep.mubr.f32.mxu1 %v1810_v45 }
  0x35   : > { %439 = vmatmul.mubr.f32.gmra.mrb[6].mxu0 %v1816_v46 }
  0x36   : > { %524 = vmatmul.mubr.f32.gmra.mrb[6].mxu1 %v1820_v47  ;;  %1369 = vmatprep.mubr.msk.f32.mxu0 %vm1497_vm0, %v1498_v49 }
  0x37   : > { %1380 = vmatprep.mubr.msk.f32.mxu1 %vm1497_vm0, %v1498_v49 }
  0x9f   : > { %v551_v25 = vpop.permute.xlu0 %550 }
  0xfc   : > { %v1289_v52 = vpop.f32.mrb[0].mxu0 }
  0xfd   : > { %v1333_v53 = vpop.f32.mrb[0].mxu1  ;;  %v1290_v54 = vpop.f32.mrb[1].mxu0 }
  0xfe   : > { %v1291_v55 = vadd.f32 %v1290_v54, %v1289_v52  ;;  %v1334_v56 = vpop.f32.mrb[1].mxu1  ;;  %v534_v52 = vld [vmem:[%s1963_s4 + $0x10] sm:$0xff]  ;;  %v539_v54 = vld [vmem:[%s1965_s6] sm:$0xff] }
  0xff   : > { %v1335_v57 = vadd.f32 %v1334_v56, %v1333_v53  ;;  %v540_v56 = vld [vmem:[%s1965_s6 + $0x8] sm:$0xff] }
 0x100   : > { %v1292_v58 = vpop.f32.mrb[2].mxu0 }
 0x101   : > { %v511_v59 = vadd.f32 %v1335_v57, %v1291_v55  ;;  %v1336_v60 = vpop.f32.mrb[2].mxu1  ;;  %v1293_v61 = vpop.f32.mrb[3].mxu0  ;;  %v541_v57 = vld [vmem:[%s1965_s6 + $0x10] sm:$0xff] }
 0x102   : > { %v1294_v62 = vadd.f32 %v1293_v61, %v1292_v58  ;;  %v1337_v63 = vpop.f32.mrb[3].mxu1 }
 0x103   : > { %v1338_v0 = vadd.f32 %v1337_v63, %v1336_v60 }
 0x104   : > { %v1295_v1 = vpop.f32.mrb[4].mxu0 }
 0x105   : > { %v516_v2 = vadd.f32 %v1338_v0, %v1294_v62  ;;  %v1339_v3 = vpop.f32.mrb[4].mxu1  ;;  %v1296_v4 = vpop.f32.mrb[5].mxu0 }
 0x106   : > { %v1297_v5 = vadd.f32 %v1296_v4, %v1295_v1  ;;  %v1340_v6 = vpop.f32.mrb[5].mxu1 }
 0x107   : > { %v1461_v7 = vpack.c.bf16 %v516_v2, %v511_v59  ;;  %v1341_v8 = vadd.f32 %v1340_v6, %v1339_v3 }
 0x108   : > { %v1298_v9 = vpop.f32.mrb[6].mxu0 }
 0x109   : > { %v521_v10 = vadd.f32 %v1341_v8, %v1297_v5  ;;  %v1342_v11 = vpop.f32.mrb[6].mxu1  ;;  %1462 = vmatpush3.bf16.msra.mxu0 %v1461_v7  ;;  %v1299_v12 = vpop.f32.mrb[7].mxu0 }
 0x10a   : > { %v1300_v13 = vadd.f32 %v1299_v12, %v1298_v9  ;;  %v1343_v14 = vpop.f32.mrb[7].mxu1  ;;  %1463 = vmatprep.subr.bf16.mxu0 %v1496_v48 }
 0x10b   : > { %v1344_v15 = vadd.f32 %v1343_v14, %v1342_v11 }
 0x10d   : > { %v526_v18 = vadd.f32 %v1344_v15, %v1300_v13 }
 0x10f   : > { %v1464_v19 = vpack.c.bf16 %v526_v18, %v521_v10 }
 0x111   : > { %1465 = vmatpush3.bf16.msra.mxu0 %v1464_v19 }
 0x114   : > { %1370 = vmatmul.mubr.msk.f32.vlgmr.msra.gmra.mrb[8].mxu0 %vm558_vm1, %v529_v20 }
 0x115   : > { %1372 = vmatprep.mubr.msk.f32.mxu0 %vm1497_vm0, %v1498_v49 }
 0x118   : > { %1373 = vmatmul.mubr.msk.f32.gmra.mrb[10].mxu0 %vm558_vm1, %v530_v21 }
 0x119   : > { %1375 = vmatprep.mubr.msk.f32.mxu0 %vm1497_vm0, %v1498_v49 }
 0x11c   : > { %1376 = vmatmul.mubr.msk.f32.gmra.mrb[12].mxu0 %vm558_vm1, %v531_v22 }
 0x11d   : > { %1025 = vmatprep.mubr.f32.mxu0 %v1498_v49 }
 0x1e7   : > { %v634_v23 = vpop.f32.mrb[8].mxu0 }
 0x1e8   : > { %v1371_v24 = vpop.f32.mrb[9].mxu0 }
 0x1e9   : > { %v535_v24 = vld [vmem:[%s1964_s5] sm:$0xff] }
 0x1eb   : > { %v639_v26 = vpop.f32.mrb[10].mxu0 }
 0x1ec   : > { %v640_v27 = vadd.f32 %v639_v26, %v551_v25  ;;  %v1374_v28 = vpop.f32.mrb[11].mxu0  ;;  %v536_v26 = vld [vmem:[%s1964_s5 + $0x8] sm:$0xff] }
 0x1ed   : > { %v537_v28 = vld [vmem:[%s1964_s5 + $0x10] sm:$0xff] }
 0x1ee   : > { %v649_v29 = vsel %vm648_vm2, %v640_v27, -inf }
 0x1ef   : > { %650 = vmax.xlane.f32.xlu0 %v649_v29  ;;  %v644_v53 = vpop.f32.mrb[12].mxu0  ;;  %v538_v29 = vld [vmem:[%s1964_s5 + $0x18] sm:$0xff] }
 0x1f0   : > { %v1377_v55 = vpop.f32.mrb[13].mxu0 }
 0x205   : > { %845 = vperm.xlu0 %1478, %v542_v30   ;;  %v946_v30 = vld [vmem:[%s1961_s2 + $0x8] sm:$0xff] }
 0x206   : > { %961 = vmatprep.subr.mxu0 %v946_v30 }
 0x27c   : > { %v651_v31 = vpop.xlane.xlu0 %650 }
 0x27d   : > { %v652_v32 = vsub.f32 %v640_v27, %v651_v31  ;;  %v948_v31 = vld [vmem:[%s1961_s2 + $0x18] sm:$0xff] }
 0x27f   : > { %v653_v33 = vmul.f32 1.442695, %v652_v32  ;;  %v945_v32 = vld [vmem:[%s1961_s2] sm:$0xff] }
 0x280   : > { %962 = vmatpush1.msra.mxu0 %v945_v32 }
 0x281   : > { %1480 = vpow2.f32 %v653_v33  ;;  %v947_v33 = vld [vmem:[%s1961_s2 + $0x10] sm:$0xff] }
 0x28b   : > { %v1481_v48 = vpop.eup %1480 }
 0x28c   : > { %v655_v50 = vsel %vm648_vm2, %v1481_v48, 0.0 }
 0x28d   : > { %656 = vadd.xlane.f32.xlu1 %v655_v50 }
 0x29e   : > { %545 = vperm.xlu1 %1479, %v532_v51  }
 0x2a2   : > { %555 = vperm.xlu1 %1479, %v534_v52  }
 0x2a6   : > { %830 = vperm.xlu1 %1479, %v539_v54  }
 0x2aa   : > { %835 = vperm.xlu1 %1479, %v540_v56  }
 0x2ae   : > { %840 = vperm.xlu1 %1479, %v541_v57  }
 0x31a   : > { %v657_v58 = vpop.xlane.xlu1 %656 }
 0x31b   : > { %1482 = vrcp.f32 %v657_v58 }
 0x31e   : > { %v546_v59 = vpop.permute.xlu1 %545 }
 0x31f   : > { %v635_v3 = vadd.f32 %v634_v23, %v546_v59  ;;  %v846_v59 = vpop.permute.xlu0 %845 }
 0x322   : > { %v556_v60 = vpop.permute.xlu1 %555 }
 0x323   : > { %v645_v61 = vadd.f32 %v644_v53, %v556_v60 }
 0x325   : > { %v1483_v62 = vpop.eup %1482  ;;  %v660_v63 = vsel %vm648_vm2, %v645_v61, -inf }
 0x326   : > { %v659_v0 = vmul.f32 %v1483_v62, %v1481_v48  ;;  %v661_v1 = vrot.slane %v660_v63, 4  ;;  %v831_v48 = vpop.permute.xlu1 %830 }
 0x328   : > { %v662_v2 = vmax.f32 %v660_v63, %v661_v1  ;;  %1379 = vmatpush3.xpose.msk.msra.mxu1 %vm648_vm2, %v659_v0 }
 0x329   : > { %1383 = vmatprep.subr.mxu1 %v1498_v49 }
 0x32a   : > { %v663_v4 = vrot.slane %v662_v2, 2  ;;  %v836_v53 = vpop.permute.xlu1 %835 }
 0x32b   : > { %1381 = vmatmul.mubr.msk.f32.vlgmr.msra.gmra.mrb[8].mxu1 %vm648_vm2, %v635_v3 }
 0x32c   : > { %v664_v5 = vmax.f32 %v662_v2, %v663_v4  ;;  %1385 = vmatprep.mubr.msk.f32.mxu1 %vm1497_vm0, %v1498_v49 }
 0x32e   : > { %v665_v6 = vrot.slane %v664_v5, 1  ;;  %v841_v57 = vpop.permute.xlu1 %840 }
 0x330   : > { %v666_v7 = vmax.f32 %v664_v5, %v665_v6 }
 0x332   : > { %v667_v8 = vsub.f32 %v645_v61, %v666_v7 }
 0x334   : > { %v668_v9 = vmul.f32 1.442695, %v667_v8 }
 0x336   : > { %1484 = vpow2.f32 %v668_v9 }
 0x340   : > { %v1485_v10 = vpop.eup %1484 }
 0x341   : > { %v670_v11 = vsel %vm648_vm2, %v1485_v10, 0.0 }
 0x342   : > { %v671_v12 = vrot.slane %v670_v11, 4 }
 0x344   : > { %v672_v13 = vadd.f32 %v671_v12, %v670_v11 }
 0x346   : > { %v673_v14 = vrot.slane %v672_v13, 2 }
 0x348   : > { %v674_v15 = vadd.f32 %v673_v14, %v672_v13 }
 0x34a   : > { %v675_v18 = vrot.slane %v674_v15, 1 }
 0x34c   : > { %v676_v19 = vadd.f32 %v675_v18, %v674_v15 }
 0x34e   : > { %1486 = vrcp.f32 %v676_v19 }
 0x358   : > { %v1487_v20 = vpop.eup %1486 }
 0x359   : > { %v678_v21 = vmul.f32 %v1487_v20, %v1485_v10 }
 0x35b   : > { %1384 = vmatpush3.msra.mxu1 %v678_v21 }
 0x3fe   : > { %v751_v22 = vpop.f32.mrb[8].mxu1 }
 0x3ff   : > { %v1382_v23 = vpop.f32.mrb[9].mxu1  ;;  %1386 = vmatmul.mubr.msk.f32.vlgmr.msra.gmra.mrb[10].mxu1 %vm648_vm2, %v751_v22 }
 0x400   : > { %1390 = vmatprep.mubr.msk.f32.mxu1 %vm648_vm2, %v535_v24 }
 0x4d2   : > { %v824_v25 = vpop.f32.mrb[10].mxu1 }
 0x4d3   : > { %v1387_v27 = vpop.f32.mrb[11].mxu1  ;;  %1388 = vmatprep.subr.mxu1 %v824_v25 }
 0x4d4   : > { %1389 = vmatpush3.msra.mxu1 %v824_v25 }
 0x4d5   : > { %1391 = vmatmul.mubr.msk.f32.vlgmr.msra.gmra.mrb[12].mxu1 %vm648_vm2, %v536_v26  ;;  %1050 = vmatprep.subr.mxu1 %v948_v31 }
 0x4d6   : > { %1393 = vmatprep.mubr.msk.f32.mxu1 %vm648_vm2, %v537_v28  ;;  %1051 = vmatpush1.msra.mxu1 %v947_v33 }
 0x4d9   : > { %1394 = vmatmul.mubr.msk.f32.gmra.mrb[14].mxu1 %vm648_vm2, %v538_v29 }
 0x4da   : > { %1114 = vmatprep.mubr.f32.mxu1 %v1498_v49 }
 0x5a8   : > { %v1392_v50 = vpop.f32.mrb[12].mxu1 }
 0x5a9   : > { %v926_v51 = vpop.f32.mrb[13].mxu1  ;;  %v932_v56 = vadd.f32 %v1392_v50, %v836_v53 }
 0x5aa   : > { %v927_v52 = vadd.f32 %v926_v51, %v831_v48 }
 0x5ac   : > { %v1395_v54 = vpop.f32.mrb[14].mxu1  ;;  %1245 = vmatmul.mubr.msk.f32.vlgmr.msra.gmra.mrb[14].mxu0 %vm648_vm2, %v927_v52  ;;  %1249 = vmatmul.mubr.msk.f32.vlgmr.msra.gmra.mrb[16].mxu1 %vm648_vm2, %v927_v52 }
 0x5ad   : > { %v936_v55 = vpop.f32.mrb[15].mxu1  ;;  %1031 = vmatprep.mubr.f32.mxu0 %v1498_v49  ;;  %1120 = vmatprep.mubr.f32.mxu1 %v1498_v49  ;;  %v942_v60 = vadd.f32 %v1395_v54, %v846_v59 }
 0x5ae   : > { %v937_v58 = vadd.f32 %v936_v55, %v841_v57 }
 0x5b0   : > { %1246 = vmatmul.mubr.msk.f32.gmra.mrb[16].mxu0 %vm648_vm2, %v932_v56  ;;  %1250 = vmatmul.mubr.msk.f32.gmra.mrb[18].mxu1 %vm648_vm2, %v932_v56 }
 0x5b1   : > { %1037 = vmatprep.mubr.f32.mxu0 %v1498_v49  ;;  %1126 = vmatprep.mubr.f32.mxu1 %v1498_v49 }
 0x5b4   : > { %1247 = vmatmul.mubr.msk.f32.gmra.mrb[18].mxu0 %vm648_vm2, %v937_v58  ;;  %1251 = vmatmul.mubr.msk.f32.gmra.mrb[20].mxu1 %vm648_vm2, %v937_v58 }
 0x5b5   : > { %1043 = vmatprep.mubr.f32.mxu0 %v1498_v49  ;;  %1132 = vmatprep.mubr.f32.mxu1 %v1498_v49 }
 0x5b8   : > { %1248 = vmatmul.mubr.msk.f32.gmra.mrb[20].mxu0 %vm648_vm2, %v942_v60  ;;  %1252 = vmatmul.mubr.msk.f32.gmra.mrb[22].mxu1 %vm648_vm2, %v942_v60 }
 0x67f   : > { %v1027_v61 = vpop.f32.mrb[14].mxu0  ;;  %v1116_v62 = vpop.f32.mrb[16].mxu1 }
 0x680   : > { %v1139_v63 = vmul.f32 %v1027_v61, %v1769_v34  ;;  %v1141_v49 = vmul.f32 %v1116_v62, %v1772_v35  ;;  %v1029_v0 = vpop.f32.mrb[15].mxu0  ;;  %v1118_v1 = vpop.f32.mrb[17].mxu1 }
 0x681   : > { %v1140_v2 = vmul.f32 %v1029_v0, %v1734_v16  ;;  %v1142_v3 = vmul.f32 %v1118_v1, %v1737_v17 }
 0x682   : > { %1155 = vst [vmem:[%s1922_s12] sm:$0xff] %v1139_v63  ;;  %1157 = vst [vmem:[%s1922_s12 + $0x10] sm:$0xff] %v1141_v49 }
 0x683   : > { %1156 = vst [vmem:[%s1922_s12 + $0x8] sm:$0xff] %v1140_v2  ;;  %1158 = vst [vmem:[%s1922_s12 + $0x18] sm:$0xff] %v1142_v3  ;;  %v1033_v4 = vpop.f32.mrb[16].mxu0  ;;  %v1122_v5 = vpop.f32.mrb[18].mxu1 }
 0x684   : > { %v1143_v34 = vmul.f32 %v1033_v4, %v1784_v38  ;;  %v1145_v35 = vmul.f32 %v1122_v5, %v1788_v39  ;;  %v1035_v6 = vpop.f32.mrb[17].mxu0  ;;  %v1124_v7 = vpop.f32.mrb[19].mxu1 }
 0x685   : > { %v1144_v16 = vmul.f32 %v1035_v6, %v1775_v36  ;;  %v1146_v17 = vmul.f32 %v1124_v7, %v1778_v37 }
 0x686   : > { %1159 = vst [vmem:[%s1922_s12 + $0x20] sm:$0xff] %v1143_v34  ;;  %1161 = vst [vmem:[%s1922_s12 + $0x30] sm:$0xff] %v1145_v35 }
 0x687   : > { %1160 = vst [vmem:[%s1922_s12 + $0x28] sm:$0xff] %v1144_v16  ;;  %1162 = vst [vmem:[%s1922_s12 + $0x38] sm:$0xff] %v1146_v17  ;;  %v1039_v8 = vpop.f32.mrb[18].mxu0  ;;  %v1128_v9 = vpop.f32.mrb[20].mxu1 }
 0x688   : > { %v1147_v38 = vmul.f32 %v1039_v8, %v1800_v42  ;;  %v1149_v39 = vmul.f32 %v1128_v9, %v1804_v43  ;;  %v1041_v10 = vpop.f32.mrb[19].mxu0  ;;  %v1130_v11 = vpop.f32.mrb[21].mxu1 }
 0x689   : > { %v1148_v36 = vmul.f32 %v1041_v10, %v1791_v40  ;;  %v1150_v37 = vmul.f32 %v1130_v11, %v1794_v41 }
 0x68a   : > { %1163 = vst [vmem:[%s1922_s12 + $0x40] sm:$0xff] %v1147_v38  ;;  %1165 = vst [vmem:[%s1922_s12 + $0x50] sm:$0xff] %v1149_v39 }
 0x68b   : > { %1164 = vst [vmem:[%s1922_s12 + $0x48] sm:$0xff] %v1148_v36  ;;  %1166 = vst [vmem:[%s1922_s12 + $0x58] sm:$0xff] %v1150_v37  ;;  %v1045_v12 = vpop.f32.mrb[20].mxu0  ;;  %v1134_v13 = vpop.f32.mrb[22].mxu1 }
 0x68c   : > { %v1151_v42 = vmul.f32 %v1045_v12, %v1816_v46  ;;  %v1153_v43 = vmul.f32 %v1134_v13, %v1820_v47  ;;  %v1047_v14 = vpop.f32.mrb[21].mxu0  ;;  %v1136_v15 = vpop.f32.mrb[23].mxu1 }
 0x68d   : > { %v1152_v18 = vmul.f32 %v1047_v14, %v1807_v44  ;;  %v1154_v40 = vmul.f32 %v1136_v15, %v1810_v45 }
 0x68e   : > { %1167 = vst [vmem:[%s1922_s12 + $0x60] sm:$0xff] %v1151_v42  ;;  %1169 = vst [vmem:[%s1922_s12 + $0x70] sm:$0xff] %v1153_v43 }
 0x68f   : > { %1168 = vst [vmem:[%s1922_s12 + $0x68] sm:$0xff] %v1152_v18  ;;  %1170 = vst [vmem:[%s1922_s12 + $0x78] sm:$0xff] %v1154_v40 }
 0x690 PF: > { %s17_s24 = sadd.s32 1, %s1494_s24  }
 0x691   : > { %p14_p4 = scmp.ge.s32.totalorder %s17_s24, 4  }
 0x693   :  { %16 = sbr.rel (!%p14_p4) target bundleno = 1 (0x1), region = 78 }

</bundles_post_ra>
